<compile_context>
chip_gen: v6e
topology: v6e:2x2x1
jax: 0.10.0
libtpu: 0.0.40
codegen_flags: <defaults>
</compile_context>

<pallas_src>
import functools

import jax
import jax.numpy as jnp
from jax.experimental import pallas as pl
from jax.experimental.pallas import tpu as pltpu


def _round_up(v, m):
    return (v + m - 1) // m * m


def _vmem_capacity_bytes():
    try:
        return int(pltpu.get_tpu_info().vmem_capacity_bytes)
    except Exception:
        return 64 * 1024 * 1024  # conservative fallback (v7x per-core VMEM)


def _conv_bn_relu_kernel(x_ref, w_ref, scale_ref, shift_ref, o_ref, acc_ref, *,
                         tap_offsets, l_pad, relu):
    """One grid step = one (batch, Cout-tile, Cin-tile) block.

    x_ref:     (1, CIN_T, L_IN)    flattened zero-padded image slab (mxu dtype)
    w_ref:     (T, COUT_T, CIN_T)  per-tap weights, T = KH*KW (mxu dtype)
    scale_ref: (COUT_T, 1)         BN scale (f32, applied to f32 accumulator)
    shift_ref: (COUT_T, 1)         BN shift (+ folded conv bias), f32
    o_ref:     (1, COUT_T, L_PAD)  output block, lane-dense along L_PAD
    acc_ref:   (COUT_T, L_PAD)     f32 accumulator (persists across Cin axis)
    """
    ci = pl.program_id(2)

    @pl.when(ci == 0)
    def _():
        acc_ref[...] = jnp.zeros_like(acc_ref)

    # KH*KW taps == KH*KW lane-offset slices of the same VMEM slab; each tap is
    # one MXU matmul accumulated in f32 (no im2col materialization anywhere).
    acc = acc_ref[...]
    for t, off in enumerate(tap_offsets):
        x_t = x_ref[0, :, pl.ds(off, l_pad)]                 # (CIN_T, L_PAD)
        acc = acc + jax.lax.dot_general(
            w_ref[t], x_t,
            dimension_numbers=(((1,), (0,)), ((), ())),
            preferred_element_type=jnp.float32)
    acc_ref[...] = acc

    @pl.when(ci == pl.num_programs(2) - 1)
    def _():
        y = acc * scale_ref[...] + shift_ref[...]            # (COUT_T,1) bcast
        if relu:
            y = jnp.maximum(y, 0.0)
        o_ref[0] = y.astype(o_ref.dtype)


def basic_conv(x_nchw, weight_oihw, gamma=None, beta=None,
               running_mean=None, running_var=None, conv_bias=None, *,
               stride=1, padding=0, dilation=1, groups=1, eps=1e-5,
               relu=True, bn=True, mxu_dtype=jnp.bfloat16, out_dtype=None,
               vmem_budget_bytes=None):
    """Forward pass of BasicConv (PyTorch NCHW / OIHW conventions)."""
    n, cin, h, w = x_nchw.shape
    cout, cin_w, kh, kw = weight_oihw.shape
    assert groups == 1 and cin_w == cin, "groups != 1 not supported"
    out_dtype = x_nchw.dtype if out_dtype is None else out_dtype

    st, dil, pd = stride, dilation, padding
    hp, wp = h + 2 * pd, w + 2 * pd
    hout1, wout1 = hp - dil * (kh - 1), wp - dil * (kw - 1)   # stride-1 extents
    assert hout1 > 0 and wout1 > 0, "kernel does not fit in padded input"
    hout = (h + 2 * pd - dil * (kh - 1) - 1) // st + 1
    wout = (w + 2 * pd - dil * (kw - 1) - 1) // st + 1

    # Flattened-raster formulation: rows keep the padded width wp so each tap is
    # a pure flat offset; wrap-around columns are computed and cropped later.
    l_out = hout1 * wp                         # valid flat extent (pre-crop)
    l_pad = _round_up(l_out, 128)              # lane-dense (unmasked) stores
    max_off = dil * (kh - 1) * wp + dil * (kw - 1)
    l_in = l_pad + max_off                     # slab length the taps may touch
    tap_offsets = tuple(ih * dil * wp + iw * dil
                        for ih in range(kh) for iw in range(kw))

    # ---- generation-aware tile / VMEM budget --------------------------------
    cap = _vmem_capacity_bytes()
    budget = int(cap * 0.55) if vmem_budget_bytes is None else int(vmem_budget_bytes)
    mxu_bytes = jnp.dtype(mxu_dtype).itemsize
    out_bytes = jnp.dtype(out_dtype).itemsize

    def block_bytes(cin_t, cout_t):
        return (2 * cin_t * l_in * mxu_bytes                  # x, double-buffered
                + 2 * kh * kw * cout_t * cin_t * mxu_bytes    # weights, double-buffered
                + 2 * cout_t * l_pad * out_bytes              # output, double-buffered
                + cout_t * l_pad * 4)                         # f32 accumulator scratch

    # Tiles below full extent must respect the (sublane=8, lane=128) grid:
    # Cout tiles are multiples of 8; Cin tiles multiples of 128 (lane dim of w).
    cin_t, cout_t = cin, cout
    while block_bytes(cin_t, cout_t) > budget:
        if cout_t > 8 and (cout_t >= cin_t or cin_t <= 128):
            cout_t = max(8, _round_up(cout_t // 2, 8))
        elif cin_t > 128:
            cin_t = max(128, _round_up(cin_t // 2, 128))
        else:
            break  # smallest legal tiles
    cin_p, cout_p = _round_up(cin, cin_t), _round_up(cout, cout_t)
    n_cin, n_cout = cin_p // cin_t, cout_p // cout_t
    vmem_limit = int(min(cap, max(cap * 3 // 4, block_bytes(cin_t, cout_t) * 5 // 4)))

    # ---- operand prep (cheap, ~1x traffic; cast to MXU dtype first) ----------
    xq = jnp.pad(x_nchw.astype(mxu_dtype), ((0, 0), (0, 0), (pd, pd), (pd, pd)))
    xf = jnp.pad(xq.reshape(n, cin, hp * wp),
                 ((0, 0), (0, cin_p - cin), (0, l_in - hp * wp)))

    w2 = jnp.transpose(weight_oihw, (2, 3, 0, 1)).reshape(kh * kw, cout, cin)
    w2 = jnp.pad(w2.astype(mxu_dtype), ((0, 0), (0, cout_p - cout), (0, cin_p - cin)))

    # BN (eval-mode running stats) + optional conv bias; applied in f32 to the
    # accumulator instead of being folded into the bf16 weights.
    if bn:
        scale = gamma.astype(jnp.float32) * jax.lax.rsqrt(
            running_var.astype(jnp.float32) + eps)
        shift = beta.astype(jnp.float32) - running_mean.astype(jnp.float32) * scale
        if conv_bias is not None:
            shift = shift + conv_bias.astype(jnp.float32) * scale
    else:
        scale = jnp.ones((cout,), jnp.float32)
        shift = (conv_bias.astype(jnp.float32) if conv_bias is not None
                 else jnp.zeros((cout,), jnp.float32))
    scale = jnp.pad(scale, (0, cout_p - cout)).reshape(cout_p, 1)
    shift = jnp.pad(shift, (0, cout_p - cout)).reshape(cout_p, 1)

    kernel = functools.partial(_conv_bn_relu_kernel, tap_offsets=tap_offsets,
                               l_pad=l_pad, relu=relu)
    out = pl.pallas_call(
        kernel,
        out_shape=jax.ShapeDtypeStruct((n, cout_p, l_pad), out_dtype),
        grid_spec=pltpu.PrefetchScalarGridSpec(
            num_scalar_prefetch=0,
            grid=(n, n_cout, n_cin),               # Cin reduction axis last
            in_specs=[
                pl.BlockSpec((1, cin_t, l_in), lambda b, co, ci: (b, ci, 0)),
                pl.BlockSpec((kh * kw, cout_t, cin_t), lambda b, co, ci: (0, co, ci)),
                pl.BlockSpec((cout_t, 1), lambda b, co, ci: (co, 0)),
                pl.BlockSpec((cout_t, 1), lambda b, co, ci: (co, 0)),
            ],
            out_specs=pl.BlockSpec((1, cout_t, l_pad), lambda b, co, ci: (b, co, 0)),
            scratch_shapes=[pltpu.VMEM((cout_t, l_pad), jnp.float32)],
        ),
        compiler_params=pltpu.CompilerParams(
            dimension_semantics=("parallel", "parallel", "arbitrary"),
            vmem_limit_bytes=vmem_limit),
    )(xf, w2, scale, shift)

    # Crop lane padding / wrap-around columns; reshape only (no transpose).
    out = out[:, :cout, :l_out].reshape(n, cout, hout1, wp)[:, :, :, :wout1]
    if st > 1:
        # TODO(synk): stride>1 computes the stride-1 conv then subsamples
        # (st^2 extra MXU work); a phase-decomposed layout would avoid it.
        out = out[:, :, ::st, ::st]
    assert out.shape == (n, cout, hout, wout)
    return out


def _reference(x, w, gamma, beta, mean, var, *, stride, padding,
               dilation=1, eps=1e-5, relu=True):
    y = jax.lax.conv_general_dilated(
        x, w, window_strides=(stride, stride),
        padding=((padding, padding), (padding, padding)),
        rhs_dilation=(dilation, dilation),
        dimension_numbers=("NCHW", "OIHW", "NCHW"),
        precision=jax.lax.Precision.HIGHEST)
    s = (gamma * jax.lax.rsqrt(var + eps)).reshape(1, -1, 1, 1)
    b = (beta - mean * gamma * jax.lax.rsqrt(var + eps)).reshape(1, -1, 1, 1)
    y = y * s + b
    return jnp.maximum(y, 0.0) if relu else y


if __name__ == "__main__":
    key = jax.random.PRNGKey(0)

    def make_case(k, n, cin, cout, h, w, ks):
        ks_ = jax.random.split(k, 6)
        x = jax.random.normal(ks_[0], (n, cin, h, w), jnp.float32)
        wt = jax.random.normal(ks_[1], (cout, cin, ks, ks), jnp.float32) * 0.05
        gamma = 1.0 + 0.1 * jax.random.normal(ks_[2], (cout,), jnp.float32)
        beta = 0.1 * jax.random.normal(ks_[3], (cout,), jnp.float32)
        mean = 0.1 * jax.random.normal(ks_[4], (cout,), jnp.float32)
        var = jax.random.uniform(ks_[5], (cout,), jnp.float32, minval=0.5, maxval=1.5)
        return x, wt, gamma, beta, mean, var

    k1, k2, k3 = jax.random.split(key, 3)

    # --- Case 1: BasicConv(4, 8, kernel_size=3, stride=1, padding=1) ---------
    x, wt, gamma, beta, mean, var = make_case(k1, 2, 4, 8, 16, 16, 3)
    ref = _reference(x, wt, gamma, beta, mean, var, stride=1, padding=1)

    out = jax.block_until_ready(
        basic_conv(x, wt, gamma, beta, mean, var, stride=1, padding=1))
    assert out.shape == ref.shape == (2, 8, 16, 16)
    assert jnp.allclose(out, ref, atol=3e-2, rtol=3e-2), "bf16 kernel mismatch"

    out32 = jax.block_until_ready(
        basic_conv(x, wt, gamma, beta, mean, var, stride=1, padding=1,
                   mxu_dtype=jnp.float32))
    assert jnp.allclose(out32, ref, atol=1e-3, rtol=1e-3), "f32 kernel mismatch"

    ref_nr = _reference(x, wt, gamma, beta, mean, var,
                        stride=1, padding=1, relu=False)
    out_nr = jax.block_until_ready(
        basic_conv(x, wt, gamma, beta, mean, var, stride=1, padding=1,
                   relu=False, mxu_dtype=jnp.float32))
    assert jnp.allclose(out_nr, ref_nr, atol=1e-3, rtol=1e-3), "relu=False mismatch"

    # --- Case 2: forces Cin/Cout tiling + channel padding (tiny VMEM budget) --
    x, wt, gamma, beta, mean, var = make_case(k2, 2, 192, 44, 8, 8, 3)
    ref = _reference(x, wt, gamma, beta, mean, var, stride=1, padding=1)
    out = jax.block_until_ready(
        basic_conv(x, wt, gamma, beta, mean, var, stride=1, padding=1,
                   mxu_dtype=jnp.float32, vmem_budget_bytes=256 * 1024))
    assert out.shape == ref.shape == (2, 44, 8, 8)
    assert jnp.allclose(out, ref, atol=2e-3, rtol=2e-3), "tiled-path mismatch"

    # --- Case 3: stride=2 downsampling conv -----------------------------------
    x, wt, gamma, beta, mean, var = make_case(k3, 1, 3, 8, 9, 9, 3)
    ref = _reference(x, wt, gamma, beta, mean, var, stride=2, padding=1)
    out = jax.block_until_ready(
        basic_conv(x, wt, gamma, beta, mean, var, stride=2, padding=1,
                   mxu_dtype=jnp.float32))
    assert out.shape == ref.shape == (1, 8, 5, 5)
    assert jnp.allclose(out, ref, atol=1e-3, rtol=1e-3), "stride=2 mismatch"

    print("KERNEL_OK")
</pallas_src>

<mosaic_0001>
module attributes {stable_mosaic.version = 11 : i64} {
  func.func @_conv_bn_relu_kernel(%arg0: i32, %arg1: i32, %arg2: i32, %arg3: memref<1x4x422xbf16, #tpu.memory_space<vmem>>, %arg4: memref<9x8x4xbf16, #tpu.memory_space<vmem>>, %arg5: memref<8x1xf32, #tpu.memory_space<vmem>>, %arg6: memref<8x1xf32, #tpu.memory_space<vmem>>, %arg7: memref<1x8x384xf32, #tpu.memory_space<vmem>>, %arg8: memref<8x384xf32, #tpu.memory_space<vmem>>) attributes {dimension_semantics = [#tpu.dimension_semantics<parallel>, #tpu.dimension_semantics<parallel>, #tpu.dimension_semantics<arbitrary>], iteration_bounds = array<i64: 2, 1, 1>, scalar_prefetch = 0 : i64, scratch_operands = 1 : i64, tpu.core_type = #tpu.core_type<tc>, window_params = [{transform_indices = @transform_0, window_bounds = array<i64: 1, 4, 422>}, {transform_indices = @transform_1, window_bounds = array<i64: 9, 8, 4>}, {transform_indices = @transform_2, window_bounds = array<i64: 8, 1>}, {transform_indices = @transform_3, window_bounds = array<i64: 8, 1>}, {transform_indices = @transform_4, window_bounds = array<i64: 1, 8, 384>}]} {
    %c0_i32 = arith.constant 0 : i32
    %0 = arith.cmpi eq, %arg2, %c0_i32 : i32
    %1 = arith.extui %0 : i1 to i32
    %c0_i32_0 = arith.constant 0 : i32
    %2 = arith.cmpi ne, %1, %c0_i32_0 : i32
    scf.if %2 {
      %cst_54 = arith.constant 0.000000e+00 : f32
      %62 = vector.broadcast %cst_54 : f32 to vector<8x384xf32>
      %c0_55 = arith.constant 0 : index
      %c0_56 = arith.constant 0 : index
      %63 = vector.load %arg8[%c0_55, %c0_56] : memref<8x384xf32, #tpu.memory_space<vmem>>, vector<8x384xf32>
      tpu.vector_store %arg8[%c0_55, %c0_56], %62 {strides = array<i32>} : memref<8x384xf32, #tpu.memory_space<vmem>>, vector<8x384xf32>,
    } else {
    }
    %c0 = arith.constant 0 : index
    %c0_1 = arith.constant 0 : index
    %3 = vector.load %arg8[%c0, %c0_1] : memref<8x384xf32, #tpu.memory_space<vmem>>, vector<8x384xf32>
    %c0_2 = arith.constant 0 : index
    %c0_3 = arith.constant 0 : index
    %c0_4 = arith.constant 0 : index
    %4 = vector.load %arg3[%c0_2, %c0_3, %c0_4] : memref<1x4x422xbf16, #tpu.memory_space<vmem>>, vector<1x4x384xbf16>
    %5 = vector.shape_cast %4 : vector<1x4x384xbf16> to vector<4x384xbf16>
    %c0_5 = arith.constant 0 : index
    %c0_6 = arith.constant 0 : index
    %c0_7 = arith.constant 0 : index
    %6 = vector.load %arg4[%c0_5, %c0_6, %c0_7] : memref<9x8x4xbf16, #tpu.memory_space<vmem>>, vector<1x8x4xbf16>
    %7 = vector.shape_cast %6 : vector<1x8x4xbf16> to vector<8x4xbf16>
    %cst = arith.constant dense<0.000000e+00> : vector<8x384xf32>
    %8 = tpu.matmul %7, %5, %cst {dimension_numbers = #tpu.dot_dimension_numbers<[1], [0], [0], [1], [0, 0, 1, 1], [], []>} : vector<8x4xbf16>, vector<4x384xbf16>, vector<8x384xf32> -> vector<8x384xf32>
    %9 = arith.addf %3, %8 : vector<8x384xf32>
    %c0_8 = arith.constant 0 : index
    %c0_9 = arith.constant 0 : index
    %c1 = arith.constant 1 : index
    %10 = vector.load %arg3[%c0_8, %c0_9, %c1] : memref<1x4x422xbf16, #tpu.memory_space<vmem>>, vector<1x4x384xbf16>
    %11 = vector.shape_cast %10 : vector<1x4x384xbf16> to vector<4x384xbf16>
    %c1_10 = arith.constant 1 : index
    %c0_11 = arith.constant 0 : index
    %c0_12 = arith.constant 0 : index
    %12 = vector.load %arg4[%c1_10, %c0_11, %c0_12] : memref<9x8x4xbf16, #tpu.memory_space<vmem>>, vector<1x8x4xbf16>
    %13 = vector.shape_cast %12 : vector<1x8x4xbf16> to vector<8x4xbf16>
    %cst_13 = arith.constant dense<0.000000e+00> : vector<8x384xf32>
    %14 = tpu.matmul %13, %11, %cst_13 {dimension_numbers = #tpu.dot_dimension_numbers<[1], [0], [0], [1], [0, 0, 1, 1], [], []>} : vector<8x4xbf16>, vector<4x384xbf16>, vector<8x384xf32> -> vector<8x384xf32>
    %15 = arith.addf %9, %14 : vector<8x384xf32>
    %c0_14 = arith.constant 0 : index
    %c0_15 = arith.constant 0 : index
    %c2 = arith.constant 2 : index
    %16 = vector.load %arg3[%c0_14, %c0_15, %c2] : memref<1x4x422xbf16, #tpu.memory_space<vmem>>, vector<1x4x384xbf16>
    %17 = vector.shape_cast %16 : vector<1x4x384xbf16> to vector<4x384xbf16>
    %c2_16 = arith.constant 2 : index
    %c0_17 = arith.constant 0 : index
    %c0_18 = arith.constant 0 : index
    %18 = vector.load %arg4[%c2_16, %c0_17, %c0_18] : memref<9x8x4xbf16, #tpu.memory_space<vmem>>, vector<1x8x4xbf16>
    %19 = vector.shape_cast %18 : vector<1x8x4xbf16> to vector<8x4xbf16>
    %cst_19 = arith.constant dense<0.000000e+00> : vector<8x384xf32>
    %20 = tpu.matmul %19, %17, %cst_19 {dimension_numbers = #tpu.dot_dimension_numbers<[1], [0], [0], [1], [0, 0, 1, 1], [], []>} : vector<8x4xbf16>, vector<4x384xbf16>, vector<8x384xf32> -> vector<8x384xf32>
    %21 = arith.addf %15, %20 : vector<8x384xf32>
    %c0_20 = arith.constant 0 : index
    %c0_21 = arith.constant 0 : index
    %c18 = arith.constant 18 : index
    %22 = vector.load %arg3[%c0_20, %c0_21, %c18] : memref<1x4x422xbf16, #tpu.memory_space<vmem>>, vector<1x4x384xbf16>
    %23 = vector.shape_cast %22 : vector<1x4x384xbf16> to vector<4x384xbf16>
    %c3 = arith.constant 3 : index
    %c0_22 = arith.constant 0 : index
    %c0_23 = arith.constant 0 : index
    %24 = vector.load %arg4[%c3, %c0_22, %c0_23] : memref<9x8x4xbf16, #tpu.memory_space<vmem>>, vector<1x8x4xbf16>
    %25 = vector.shape_cast %24 : vector<1x8x4xbf16> to vector<8x4xbf16>
    %cst_24 = arith.constant dense<0.000000e+00> : vector<8x384xf32>
    %26 = tpu.matmul %25, %23, %cst_24 {dimension_numbers = #tpu.dot_dimension_numbers<[1], [0], [0], [1], [0, 0, 1, 1], [], []>} : vector<8x4xbf16>, vector<4x384xbf16>, vector<8x384xf32> -> vector<8x384xf32>
    %27 = arith.addf %21, %26 : vector<8x384xf32>
    %c0_25 = arith.constant 0 : index
    %c0_26 = arith.constant 0 : index
    %c19 = arith.constant 19 : index
    %28 = vector.load %arg3[%c0_25, %c0_26, %c19] : memref<1x4x422xbf16, #tpu.memory_space<vmem>>, vector<1x4x384xbf16>
    %29 = vector.shape_cast %28 : vector<1x4x384xbf16> to vector<4x384xbf16>
    %c4 = arith.constant 4 : index
    %c0_27 = arith.constant 0 : index
    %c0_28 = arith.constant 0 : index
    %30 = vector.load %arg4[%c4, %c0_27, %c0_28] : memref<9x8x4xbf16, #tpu.memory_space<vmem>>, vector<1x8x4xbf16>
    %31 = vector.shape_cast %30 : vector<1x8x4xbf16> to vector<8x4xbf16>
    %cst_29 = arith.constant dense<0.000000e+00> : vector<8x384xf32>
    %32 = tpu.matmul %31, %29, %cst_29 {dimension_numbers = #tpu.dot_dimension_numbers<[1], [0], [0], [1], [0, 0, 1, 1], [], []>} : vector<8x4xbf16>, vector<4x384xbf16>, vector<8x384xf32> -> vector<8x384xf32>
    %33 = arith.addf %27, %32 : vector<8x384xf32>
    %c0_30 = arith.constant 0 : index
    %c0_31 = arith.constant 0 : index
    %c20 = arith.constant 20 : index
    %34 = vector.load %arg3[%c0_30, %c0_31, %c20] : memref<1x4x422xbf16, #tpu.memory_space<vmem>>, vector<1x4x384xbf16>
    %35 = vector.shape_cast %34 : vector<1x4x384xbf16> to vector<4x384xbf16>
    %c5 = arith.constant 5 : index
    %c0_32 = arith.constant 0 : index
    %c0_33 = arith.constant 0 : index
    %36 = vector.load %arg4[%c5, %c0_32, %c0_33] : memref<9x8x4xbf16, #tpu.memory_space<vmem>>, vector<1x8x4xbf16>
    %37 = vector.shape_cast %36 : vector<1x8x4xbf16> to vector<8x4xbf16>
    %cst_34 = arith.constant dense<0.000000e+00> : vector<8x384xf32>
    %38 = tpu.matmul %37, %35, %cst_34 {dimension_numbers = #tpu.dot_dimension_numbers<[1], [0], [0], [1], [0, 0, 1, 1], [], []>} : vector<8x4xbf16>, vector<4x384xbf16>, vector<8x384xf32> -> vector<8x384xf32>
    %39 = arith.addf %33, %38 : vector<8x384xf32>
    %c0_35 = arith.constant 0 : index
    %c0_36 = arith.constant 0 : index
    %c36 = arith.constant 36 : index
    %40 = vector.load %arg3[%c0_35, %c0_36, %c36] : memref<1x4x422xbf16, #tpu.memory_space<vmem>>, vector<1x4x384xbf16>
    %41 = vector.shape_cast %40 : vector<1x4x384xbf16> to vector<4x384xbf16>
    %c6 = arith.constant 6 : index
    %c0_37 = arith.constant 0 : index
    %c0_38 = arith.constant 0 : index
    %42 = vector.load %arg4[%c6, %c0_37, %c0_38] : memref<9x8x4xbf16, #tpu.memory_space<vmem>>, vector<1x8x4xbf16>
    %43 = vector.shape_cast %42 : vector<1x8x4xbf16> to vector<8x4xbf16>
    %cst_39 = arith.constant dense<0.000000e+00> : vector<8x384xf32>
    %44 = tpu.matmul %43, %41, %cst_39 {dimension_numbers = #tpu.dot_dimension_numbers<[1], [0], [0], [1], [0, 0, 1, 1], [], []>} : vector<8x4xbf16>, vector<4x384xbf16>, vector<8x384xf32> -> vector<8x384xf32>
    %45 = arith.addf %39, %44 : vector<8x384xf32>
    %c0_40 = arith.constant 0 : index
    %c0_41 = arith.constant 0 : index
    %c37 = arith.constant 37 : index
    %46 = vector.load %arg3[%c0_40, %c0_41, %c37] : memref<1x4x422xbf16, #tpu.memory_space<vmem>>, vector<1x4x384xbf16>
    %47 = vector.shape_cast %46 : vector<1x4x384xbf16> to vector<4x384xbf16>
    %c7 = arith.constant 7 : index
    %c0_42 = arith.constant 0 : index
    %c0_43 = arith.constant 0 : index
    %48 = vector.load %arg4[%c7, %c0_42, %c0_43] : memref<9x8x4xbf16, #tpu.memory_space<vmem>>, vector<1x8x4xbf16>
    %49 = vector.shape_cast %48 : vector<1x8x4xbf16> to vector<8x4xbf16>
    %cst_44 = arith.constant dense<0.000000e+00> : vector<8x384xf32>
    %50 = tpu.matmul %49, %47, %cst_44 {dimension_numbers = #tpu.dot_dimension_numbers<[1], [0], [0], [1], [0, 0, 1, 1], [], []>} : vector<8x4xbf16>, vector<4x384xbf16>, vector<8x384xf32> -> vector<8x384xf32>
    %51 = arith.addf %45, %50 : vector<8x384xf32>
    %c0_45 = arith.constant 0 : index
    %c0_46 = arith.constant 0 : index
    %c38 = arith.constant 38 : index
    %52 = vector.load %arg3[%c0_45, %c0_46, %c38] : memref<1x4x422xbf16, #tpu.memory_space<vmem>>, vector<1x4x384xbf16>
    %53 = vector.shape_cast %52 : vector<1x4x384xbf16> to vector<4x384xbf16>
    %c8 = arith.constant 8 : index
    %c0_47 = arith.constant 0 : index
    %c0_48 = arith.constant 0 : index
    %54 = vector.load %arg4[%c8, %c0_47, %c0_48] : memref<9x8x4xbf16, #tpu.memory_space<vmem>>, vector<1x8x4xbf16>
    %55 = vector.shape_cast %54 : vector<1x8x4xbf16> to vector<8x4xbf16>
    %cst_49 = arith.constant dense<0.000000e+00> : vector<8x384xf32>
    %56 = tpu.matmul %55, %53, %cst_49 {dimension_numbers = #tpu.dot_dimension_numbers<[1], [0], [0], [1], [0, 0, 1, 1], [], []>} : vector<8x4xbf16>, vector<4x384xbf16>, vector<8x384xf32> -> vector<8x384xf32>
    %57 = arith.addf %51, %56 : vector<8x384xf32>
    %c0_50 = arith.constant 0 : index
    %c0_51 = arith.constant 0 : index
    %58 = vector.load %arg8[%c0_50, %c0_51] : memref<8x384xf32, #tpu.memory_space<vmem>>, vector<8x384xf32>
    tpu.vector_store %arg8[%c0_50, %c0_51], %57 {strides = array<i32>} : memref<8x384xf32, #tpu.memory_space<vmem>>, vector<8x384xf32>,
    %c0_i32_52 = arith.constant 0 : i32
    %59 = arith.cmpi eq, %arg2, %c0_i32_52 : i32
    %60 = arith.extui %59 : i1 to i32
    %c0_i32_53 = arith.constant 0 : i32
    %61 = arith.cmpi ne, %60, %c0_i32_53 : i32
    scf.if %61 {
      %c0_54 = arith.constant 0 : index
      %c0_55 = arith.constant 0 : index
      %62 = vector.load %arg5[%c0_54, %c0_55] : memref<8x1xf32, #tpu.memory_space<vmem>>, vector<8x1xf32>
      %63 = vector.broadcast %62 : vector<8x1xf32> to vector<8x384xf32>
      %64 = arith.mulf %57, %63 : vector<8x384xf32>
      %c0_56 = arith.constant 0 : index
      %c0_57 = arith.constant 0 : index
      %65 = vector.load %arg6[%c0_56, %c0_57] : memref<8x1xf32, #tpu.memory_space<vmem>>, vector<8x1xf32>
      %66 = vector.broadcast %65 : vector<8x1xf32> to vector<8x384xf32>
      %67 = arith.addf %64, %66 : vector<8x384xf32>
      %cst_58 = arith.constant 0.000000e+00 : f32
      %68 = vector.broadcast %cst_58 : f32 to vector<8x384xf32>
      %69 = arith.maximumf %67, %68 : vector<8x384xf32>
      %c0_59 = arith.constant 0 : index
      %c0_60 = arith.constant 0 : index
      %c0_61 = arith.constant 0 : index
      %70 = vector.load %arg7[%c0_59, %c0_60, %c0_61] : memref<1x8x384xf32, #tpu.memory_space<vmem>>, vector<1x8x384xf32>
      %71 = vector.shape_cast %70 : vector<1x8x384xf32> to vector<8x384xf32>
      %72 = vector.shape_cast %69 : vector<8x384xf32> to vector<1x8x384xf32>
      tpu.vector_store %arg7[%c0_59, %c0_60, %c0_61], %72 {strides = array<i32>} : memref<1x8x384xf32, #tpu.memory_space<vmem>>, vector<1x8x384xf32>,
    } else {
    }
    return
  }
  func.func @transform_0(%arg0: i32, %arg1: i32, %arg2: i32) -> (i32, i32, i32) {
    %c0_i32 = arith.constant 0 : i32
    %c0_i32_0 = arith.constant 0 : i32
    return %arg0, %arg2, %c0_i32 : i32, i32, i32
  }
  func.func @transform_1(%arg0: i32, %arg1: i32, %arg2: i32) -> (i32, i32, i32) {
    %c0_i32 = arith.constant 0 : i32
    %c0_i32_0 = arith.constant 0 : i32
    return %c0_i32, %arg1, %arg2 : i32, i32, i32
  }
  func.func @transform_2(%arg0: i32, %arg1: i32, %arg2: i32) -> (i32, i32) {
    %c0_i32 = arith.constant 0 : i32
    %c0_i32_0 = arith.constant 0 : i32
    return %arg1, %c0_i32 : i32, i32
  }
  func.func @transform_3(%arg0: i32, %arg1: i32, %arg2: i32) -> (i32, i32) {
    %c0_i32 = arith.constant 0 : i32
    %c0_i32_0 = arith.constant 0 : i32
    return %arg1, %c0_i32 : i32, i32
  }
  func.func @transform_4(%arg0: i32, %arg1: i32, %arg2: i32) -> (i32, i32, i32) {
    %c0_i32 = arith.constant 0 : i32
    %c0_i32_0 = arith.constant 0 : i32
    return %arg0, %arg1, %c0_i32 : i32, i32, i32
  }
}

</mosaic_0001>

<bundles_post_ra>
// kernel: tpu_custom_call.1
= control target key start
LH: loop header
LB: loop body
LE: loop exit
PB: predicated region body
PF: predicated region fallthrough
CT: control target
= control target key end

     0   :  { %9 = vsyncpa [#allocation4], 0  ;;  %s2165_s0 = inlined_call_operand.vmem [shape: bf16[2,4,422], index: 0, kind: input, shape index: {}]   ;;  %s2166_s1 = inlined_call_operand.vmem [shape: bf16[9,8,4], index: 1, kind: input, shape index: {}]   ;;  %s2167_s2 = inlined_call_operand.vmem [shape: f32[8,1], index: 2, kind: input, shape index: {}]   ;;  %s2168_s3 = inlined_call_operand.vmem [shape: f32[8,1], index: 3, kind: input, shape index: {}]   ;;  %s2169_s4 = inlined_call_operand.hbm [shape: f32[2,8,384], index: 4, kind: output, shape index: {}]  }
   0x1   :  { %11 = vsyncpa [#allocation4 + $0x1], 0  ;;  %s1940_s15 = smov 0   ;;  %s1942_s16 = smov 0  }
   0x2   :  { %s1944_s17 = smov 0   ;;  %s1946_s18 = smov 0  }
   0x3   :  { %s1948_s19 = smov 0   ;;  %s1950_s20 = smov 0  }
   0x4 LB: > { %s1630_s21 = sadd.s32 4294967295, %s1900_s20   ;;  %s1631_s22 = sadd.s32 4294967294, %s1900_s20   ;;  %s1900_s20 = sphi %s1950_s20, %s17_s20   ;;  %s1896_s19 = sphi %s1948_s19, %s2176_s19   ;;  %s1892_s18 = sphi %s1946_s18, %s2175_s18   ;;  %s1888_s17 = sphi %s1944_s17, %s2174_s17   ;;  %s1884_s16 = sphi %s1942_s16, %s2173_s16   ;;  %s1880_s15 = sphi %s1940_s15, %s2172_s15  }
   0x5   : > { %s36_s23 = sadd.s32 1, %s1896_s19  ;;  %s153_s24 = sadd.s32 1, %s1888_s17 }
   0x6   : > { %p38_p0 = scmp.ge.s32.totalorder %s36_s23, 2  ;;  %p163_p1 = scmp.ne.s32.totalorder %s1888_s17, %s1884_s16 }
   0x7   : > { %p164_p2 = scmp.eq.s32.totalorder %s1630_s21, 1  ;;  %p169_p3 = scmp.ne.s32.totalorder %s1884_s16, %s1880_s15 }
   0x8   : > { %s2178_s23 = smov (%p38_p0, %s36_s23), 0  ;;  %p170_p5 = scmp.eq.s32.totalorder %s1631_s22, 1 }
   0x9   : > { %p1980_p4 = por %p164_p2, %p163_p1  ;;  %s148_s26 = ssub.s32 %s1896_s19, %s2178_s23 }
   0xa   : > { %p1637_p6 = scmp.ge.s32.totalorder %s1900_s20, 1  ;;  %p151_p7 = scmp.eq.s32.totalorder %s148_s26, 0 }
   0xb   : > { %p1987_p8 = por %p170_p5, %p169_p3  ;;  %p224_p9 = scmp.lt.s32.totalorder %s1900_s20, 3 }
   0xc   : > { %s1993_s28 = scalar_select %p151_p7, %s1888_s17, %s153_s24  }
   0xd   : > { %p225_p10 = pnand %p1637_p6, %p224_p9 }
   0xe   : > { %p269_p11 = scmp.lt.s32.totalorder (!%p225_p10), %s1892_s18, 1  ;;  %s1906_s8 = smov (!%p225_p10), 127  }
   0xf   : > { %228 = sbr.rel (%p225_p10) target bundleno = 425 (0x1a9), region = 36  ;;  %s1907_s11 = smov (!%p225_p10), 126  }
  0x10   : > { %s1908_s12 = smov (!%p225_p10), 110   ;;  %s1909_s13 = smov (!%p225_p10), 109  }
  0x11   : > { %s1910_s14 = smov (!%p225_p10), 108   ;;  %s1911_s21 = smov (!%p225_p10), 92  }
  0x12   : > { %s1912_s22 = smov (!%p225_p10), 91   ;;  %s1913_s24 = smov (!%p225_p10), 90  }
  0x13   : > { %s266_s6 = sand.u32 (!%p225_p10), 1, %s1884_s16  }
  0x14   : > { %v311_v0 = vlaneseq  ;;  %v1902_v1 = vmov 1983009808   ;;  %v1903_v3 = vmov 0.0   ;;  %s270_s29 = scalar_select %p269_p11, %s1892_s18, 1  ;;  %v1904_v5 = vmov 0   ;;  %v1459_v22 = vld [vmem:[%s2167_s2] sm:$0xff] }
  0x15   : > { %v309_v2 = vunpack.c.l.s4 %v1902_v1  ;;  %1697 = vmatprep.subr.bf16.mxu1 %v1903_v3  ;;  %369 = vmatprep.mubr.bf16.mxu0 %v1904_v5  ;;  %vm1905_vm0 = vmmov 0   ;;  %vm327_vm1 = vcmask 1041408   ;;  %v305_v21 = vld [vmem:[%s2166_s1] sm:$0xf]  ;;  %vm323_vm2 = vcmask 31744  }
  0x16   : > { %v312_v4 = vshrl.u32 %v311_v0, 7  ;;  %1820 = vset.pattern.permute.xlu0 %v1904_v5  ;;  %1699 = vmatprep.mubr.msk.bf16.mxu1 %vm1905_vm0, %v1903_v3  ;;  %s1678_s30 = sshll.u32 %s270_s29, 3  ;;  %v1468_v23 = vld [vmem:[%s2168_s3] sm:$0xff]  ;;  %vm450_vm3 = vcmask 1039360   ;;  %vm579_vm4 = vcmask 1031168   ;;  %vm708_vm5 = vcmask 900096  }
  0x17   : > { %v310_v6 = vunpack.c.0.s8 %v309_v2  ;;  %1821 = vset.pattern.permute.xlu1 %v1904_v5  ;;  %s277_s7 = scalar_lea.vmem %s2165_s0, %s1678_s30  ;;  %v1643_v32 = vld [vmem:[%s2166_s1 + $0x4] sm:$0xf]  ;;  %v1647_v42 = vld [vmem:[%s2166_s1 + $0x8] sm:$0xf]  ;;  %v1651_v52 = vld [vmem:[%s2166_s1 + $0xc] sm:$0xf] }
  0x18   : > { %v421_v8 = vld [vmem:[%s277_s7] sm:$0xff]  ;;  %vm837_vm6 = vcmask 891904   ;;  %v1655_v62 = vld [vmem:[%s2166_s1 + $0x10] sm:$0xf]  ;;  %vm966_vm7 = vcmask 883712   ;;  %vm1095_vm8 = vcmask 752640  }
  0x19   : > { %v313_v7 = vsub.s32 %v310_v6, %v312_v4  ;;  %v304_v9 = vld [vmem:[%s277_s7] sm:$0x3f]  ;;  %v425_v11 = vcombine.high %v421_v8, %v421_v8  ;;  %vm1224_vm9 = vcmask 744448   ;;  %vm1353_vm10 = vcmask 736256   ;;  %s1751_s7 = smul.u32 24, %s266_s6 }
  0x1a   : > { %v307_v13 = vcombine.high %v304_v9, %v304_v9 }
  0x1b   : > { %v432_v10 = vrot.slane %v421_v8, %v313_v7  ;;  %v314_v12 = vrot.slane %v304_v9, %v313_v7  ;;  %v439_v15 = vrot.slane %v425_v11, %v313_v7  ;;  %s268_s9 = scalar_lea.vmem [#allocation3], %s1751_s7 }
  0x1c   : > { %v321_v18 = vrot.slane %v307_v13, %v313_v7  ;;  %s1500_s10 = sshll.u32 %s268_s9, 4  ;;  %s1501_s10 = int_to_ptr.vmem [resolvable:$true] %s1500_s10 }
  0x1d   : > { %442 = vrot.lane.b32.xlu0 %v432_v10, %s1906_s8  ;;  %v440_v14 = vcombine.high %v432_v10, %v432_v10  ;;  %v322_v16 = vcombine.high %v314_v12, %v314_v12  ;;  %v329_v17 = vsel %vm327_vm1, %v314_v12, 0  ;;  %446 = vrot.lane.b32.xlu1 %v439_v15, %s1906_s8  ;;  %v441_v19 = vcombine.high %v439_v15, %v439_v15 }
  0x1e   : > { %v335_v20 = vsel %vm327_vm1, %v321_v18, 0 }
  0x1f   : > { %1640 = vmatprep.subr.msk.bf16.mxu0 %vm327_vm1, %v322_v16  ;;  %1698 = vmatpush3.bf16.msra.mxu1 %v335_v20  ;;  %v1663_v20 = vld [vmem:[%s2166_s1 + $0x18] sm:$0xf] }
  0x20   : > { %352 = vmatpush1.bf16.msra.mxu0 %v329_v17  ;;  %1703 = vmatprep.subr.bf16.mxu1 %v1903_v3 }
  0x21   : > { %444 = vrot.lane.b32.xlu0 %v440_v14, %s1906_s8  ;;  %448 = vrot.lane.b32.xlu1 %v441_v19, %s1906_s8  ;;  %s1752_s8 = smul.u32 384, %s1892_s18  ;;  %s1484_s18 = scalar_lea.sflag [#allocation4], %s266_s6 }
  0x22   : > { %1700 = vmatmul.mubr.msk.bf16.vlgmr.msra.gmra.mxu1 %vm323_vm2, %v305_v21 }
  0x23   : > { %1641 = vmatmul.mubr.msk.bf16.vlgmr.msra.gmra.mxu0 %vm323_vm2, %v305_v21  ;;  %1705 = vmatprep.mubr.msk.bf16.mxu1 %vm1905_vm0, %v1903_v3 }
  0x24   : > { %498 = vmatprep.mubr.bf16.mxu0 %v1904_v5 }
  0x25   : > { %571 = vrot.lane.b32.xlu0 %v432_v10, %s1907_s11  ;;  %573 = vrot.lane.b32.xlu1 %v440_v14, %s1907_s11 }
  0x29   : > { %575 = vrot.lane.b32.xlu0 %v439_v15, %s1907_s11  ;;  %577 = vrot.lane.b32.xlu1 %v441_v19, %s1907_s11 }
  0x2d   : > { %700 = vrot.lane.b32.xlu0 %v432_v10, %s1908_s12  ;;  %702 = vrot.lane.b32.xlu1 %v440_v14, %s1908_s12 }
  0x31   : > { %704 = vrot.lane.b32.xlu0 %v439_v15, %s1908_s12  ;;  %706 = vrot.lane.b32.xlu1 %v441_v19, %s1908_s12 }
  0x35   : > { %829 = vrot.lane.b32.xlu0 %v432_v10, %s1909_s13  ;;  %831 = vrot.lane.b32.xlu1 %v440_v14, %s1909_s13 }
  0x39   : > { %833 = vrot.lane.b32.xlu0 %v439_v15, %s1909_s13  ;;  %835 = vrot.lane.b32.xlu1 %v441_v19, %s1909_s13  ;;  %s2123_s13 = scalar_lea.hbm %s2169_s4, %s1752_s8 }
  0x3d   : > { %958 = vrot.lane.b32.xlu0 %v432_v10, %s1910_s14  ;;  %960 = vrot.lane.b32.xlu1 %v440_v14, %s1910_s14 }
  0x41   : > { %962 = vrot.lane.b32.xlu0 %v439_v15, %s1910_s14  ;;  %964 = vrot.lane.b32.xlu1 %v441_v19, %s1910_s14  ;;  %s1824_s14 = scalar_lea.vmem %s1501_s10, 384 }
  0x42   : > { %p1825_p12 = scmp.ne.s32.totalorder %s1501_s10, %s1824_s14 }
  0x44   : > { %p1826_p13 = pnand %p1825_p12, %p1980_p4 }
  0x45   : > { %1087 = vrot.lane.b32.xlu0 %v432_v10, %s1911_s21  ;;  %1089 = vrot.lane.b32.xlu1 %v440_v14, %s1911_s21 }
  0x46   : > { %p1827_p0 = pneg %p1826_p13 }
  0x49   : > { %1091 = vrot.lane.b32.xlu0 %v439_v15, %s1911_s21  ;;  %1093 = vrot.lane.b32.xlu1 %v441_v19, %s1911_s21  ;;  %s1914_s21 = smov [#allocation3]  }
  0x4d   : > { %1216 = vrot.lane.b32.xlu0 %v432_v10, %s1912_s22  ;;  %1218 = vrot.lane.b32.xlu1 %v440_v14, %s1912_s22 }
  0x51   : > { %1220 = vrot.lane.b32.xlu0 %v439_v15, %s1912_s22  ;;  %1222 = vrot.lane.b32.xlu1 %v441_v19, %s1912_s22  ;;  %s1828_s22 = sshll.u32 %s1914_s21, 4  ;;  %s1829_s22 = int_to_ptr.vmem [resolvable:$false] %s1828_s22 }
  0x52   : > { %p1831_p1 = scmp.lt.s32.totalorder %s1501_s10, %s1829_s22 }
  0x55   : > { %1345 = vrot.lane.b32.xlu0 %v432_v10, %s1913_s24  ;;  %1347 = vrot.lane.b32.xlu1 %v440_v14, %s1913_s24  ;;  %v1659_v10 = vld [vmem:[%s2166_s1 + $0x14] sm:$0xf] }
  0x59   : > { %1349 = vrot.lane.b32.xlu0 %v439_v15, %s1913_s24  ;;  %1351 = vrot.lane.b32.xlu1 %v441_v19, %s1913_s24  ;;  %s1830_s24 = scalar_lea.vmem %s1829_s22, 768 }
  0x5a   : > { %p1832_p2 = scmp.lt.s32.totalorder %s1830_s24, %s1824_s14 }
  0x5c   : > { %p1833_p3 = por %p1832_p2, %p1831_p1 }
  0x5d   : > { %1462 = vperm.xlu0 %1820, %v1459_v22   ;;  %1471 = vperm.xlu1 %1821, %v1468_v23  }
  0x5e   : > { %p1834_p5 = pnand %p1833_p3, %p1827_p0 }
  0x8f   : > { %v443_v24 = vpop.permute.xlu0 %442  ;;  %v447_v25 = vpop.permute.xlu1 %446 }
  0x93   : > { %v445_v26 = vpop.permute.xlu0 %444  ;;  %v449_v30 = vpop.permute.xlu1 %448 }
  0x94   : > { %v451_v27 = vsel %vm450_vm3, %v443_v24, %v445_v26  ;;  %v452_v28 = vsel %vm450_vm3, %v445_v26, %v447_v25  ;;  %v453_v31 = vsel %vm450_vm3, %v447_v25, %v449_v30  ;;  %v1667_v30 = vld [vmem:[%s2166_s1 + $0x1c] sm:$0xf] }
  0x95   : > { %v458_v29 = vsel %vm327_vm1, %v451_v27, 0  ;;  %1644 = vmatprep.subr.msk.bf16.mxu0 %vm327_vm1, %v452_v28  ;;  %v464_v33 = vsel %vm327_vm1, %v453_v31, 0 }
  0x96   : > { %481 = vmatpush1.bf16.msra.mxu0 %v458_v29  ;;  %1704 = vmatpush3.bf16.msra.mxu1 %v464_v33 }
  0x97   : > { %v572_v34 = vpop.permute.xlu0 %571  ;;  %v574_v35 = vpop.permute.xlu1 %573  ;;  %1709 = vmatprep.subr.bf16.mxu1 %v1903_v3 }
  0x98   : > { %v580_v36 = vsel %vm579_vm4, %v572_v34, %v574_v35 }
  0x99   : > { %1645 = vmatmul.mubr.msk.bf16.vlgmr.msra.gmra.mxu0 %vm323_vm2, %v1643_v32  ;;  %1706 = vmatmul.mubr.msk.bf16.vlgmr.msra.gmra.mxu1 %vm323_vm2, %v1643_v32  ;;  %v587_v39 = vsel %vm327_vm1, %v580_v36, 0 }
  0x9a   : > { %627 = vmatprep.mubr.bf16.mxu0 %v1904_v5  ;;  %1711 = vmatprep.mubr.msk.bf16.mxu1 %vm1905_vm0, %v1903_v3 }
  0x9b   : > { %v576_v37 = vpop.permute.xlu0 %575  ;;  %v578_v40 = vpop.permute.xlu1 %577 }
  0x9c   : > { %v581_v38 = vsel %vm579_vm4, %v574_v35, %v576_v37  ;;  %v582_v41 = vsel %vm579_vm4, %v576_v37, %v578_v40  ;;  %v1671_v40 = vld [vmem:[%s2166_s1 + $0x20] sm:$0xf] }
  0x9d   : > { %1648 = vmatprep.subr.msk.bf16.mxu0 %vm327_vm1, %v581_v38  ;;  %v593_v43 = vsel %vm327_vm1, %v582_v41, 0 }
  0x9e   : > { %610 = vmatpush1.bf16.msra.mxu0 %v587_v39  ;;  %1710 = vmatpush3.bf16.msra.mxu1 %v593_v43 }
  0x9f   : > { %v701_v44 = vpop.permute.xlu0 %700  ;;  %v703_v45 = vpop.permute.xlu1 %702  ;;  %1715 = vmatprep.subr.bf16.mxu1 %v1903_v3 }
  0xa0   : > { %v709_v46 = vsel %vm708_vm5, %v701_v44, %v703_v45 }
  0xa1   : > { %1649 = vmatmul.mubr.msk.bf16.vlgmr.msra.gmra.mxu0 %vm323_vm2, %v1647_v42  ;;  %1712 = vmatmul.mubr.msk.bf16.vlgmr.msra.gmra.mxu1 %vm323_vm2, %v1647_v42  ;;  %v716_v49 = vsel %vm327_vm1, %v709_v46, 0 }
  0xa2   : > { %756 = vmatprep.mubr.bf16.mxu0 %v1904_v5  ;;  %1717 = vmatprep.mubr.msk.bf16.mxu1 %vm1905_vm0, %v1903_v3 }
  0xa3   : > { %v705_v47 = vpop.permute.xlu0 %704  ;;  %v707_v50 = vpop.permute.xlu1 %706 }
  0xa4   : > { %v710_v48 = vsel %vm708_vm5, %v703_v45, %v705_v47  ;;  %v711_v51 = vsel %vm708_vm5, %v705_v47, %v707_v50 }
  0xa5   : > { %1652 = vmatprep.subr.msk.bf16.mxu0 %vm327_vm1, %v710_v48  ;;  %v722_v53 = vsel %vm327_vm1, %v711_v51, 0 }
  0xa6   : > { %739 = vmatpush1.bf16.msra.mxu0 %v716_v49  ;;  %1716 = vmatpush3.bf16.msra.mxu1 %v722_v53 }
  0xa7   : > { %v830_v54 = vpop.permute.xlu0 %829  ;;  %v832_v55 = vpop.permute.xlu1 %831  ;;  %1721 = vmatprep.subr.bf16.mxu1 %v1903_v3 }
  0xa8   : > { %v838_v56 = vsel %vm837_vm6, %v830_v54, %v832_v55 }
  0xa9   : > { %1653 = vmatmul.mubr.msk.bf16.vlgmr.msra.gmra.mxu0 %vm323_vm2, %v1651_v52  ;;  %1718 = vmatmul.mubr.msk.bf16.vlgmr.msra.gmra.mxu1 %vm323_vm2, %v1651_v52  ;;  %v845_v59 = vsel %vm327_vm1, %v838_v56, 0 }
  0xaa   : > { %885 = vmatprep.mubr.bf16.mxu0 %v1904_v5  ;;  %1723 = vmatprep.mubr.msk.bf16.mxu1 %vm1905_vm0, %v1903_v3 }
  0xab   : > { %v834_v57 = vpop.permute.xlu0 %833  ;;  %v836_v60 = vpop.permute.xlu1 %835 }
  0xac   : > { %v839_v58 = vsel %vm837_vm6, %v832_v55, %v834_v57  ;;  %v840_v61 = vsel %vm837_vm6, %v834_v57, %v836_v60 }
  0xad   : > { %1656 = vmatprep.subr.msk.bf16.mxu0 %vm327_vm1, %v839_v58  ;;  %v851_v63 = vsel %vm327_vm1, %v840_v61, 0 }
  0xae   : > { %868 = vmatpush1.bf16.msra.mxu0 %v845_v59  ;;  %1722 = vmatpush3.bf16.msra.mxu1 %v851_v63 }
  0xaf   : > { %v959_v0 = vpop.permute.xlu0 %958  ;;  %v961_v1 = vpop.permute.xlu1 %960  ;;  %1727 = vmatprep.subr.bf16.mxu1 %v1903_v3 }
  0xb0   : > { %v967_v2 = vsel %vm966_vm7, %v959_v0, %v961_v1 }
  0xb1   : > { %1657 = vmatmul.mubr.msk.bf16.vlgmr.msra.gmra.mxu0 %vm323_vm2, %v1655_v62  ;;  %1724 = vmatmul.mubr.msk.bf16.vlgmr.msra.gmra.mxu1 %vm323_vm2, %v1655_v62  ;;  %v974_v7 = vsel %vm327_vm1, %v967_v2, 0 }
  0xb2   : > { %1014 = vmatprep.mubr.bf16.mxu0 %v1904_v5  ;;  %1729 = vmatprep.mubr.msk.bf16.mxu1 %vm1905_vm0, %v1903_v3 }
  0xb3   : > { %v963_v4 = vpop.permute.xlu0 %962  ;;  %v965_v8 = vpop.permute.xlu1 %964 }
  0xb4   : > { %v968_v6 = vsel %vm966_vm7, %v961_v1, %v963_v4  ;;  %v969_v9 = vsel %vm966_vm7, %v963_v4, %v965_v8 }
  0xb5   : > { %1660 = vmatprep.subr.msk.bf16.mxu0 %vm327_vm1, %v968_v6  ;;  %v980_v11 = vsel %vm327_vm1, %v969_v9, 0 }
  0xb6   : > { %997 = vmatpush1.bf16.msra.mxu0 %v974_v7  ;;  %1728 = vmatpush3.bf16.msra.mxu1 %v980_v11 }
  0xb7   : > { %v1088_v12 = vpop.permute.xlu0 %1087  ;;  %v1090_v13 = vpop.permute.xlu1 %1089  ;;  %1733 = vmatprep.subr.bf16.mxu1 %v1903_v3 }
  0xb8   : > { %v1096_v14 = vsel %vm1095_vm8, %v1088_v12, %v1090_v13 }
  0xb9   : > { %1661 = vmatmul.mubr.msk.bf16.vlgmr.msra.gmra.mxu0 %vm323_vm2, %v1659_v10  ;;  %1730 = vmatmul.mubr.msk.bf16.vlgmr.msra.gmra.mxu1 %vm323_vm2, %v1659_v10  ;;  %v1103_v17 = vsel %vm327_vm1, %v1096_v14, 0 }
  0xba   : > { %1143 = vmatprep.mubr.bf16.mxu0 %v1904_v5  ;;  %1735 = vmatprep.mubr.msk.bf16.mxu1 %vm1905_vm0, %v1903_v3 }
  0xbb   : > { %v1092_v15 = vpop.permute.xlu0 %1091  ;;  %v1094_v18 = vpop.permute.xlu1 %1093 }
  0xbc   : > { %v1097_v16 = vsel %vm1095_vm8, %v1090_v13, %v1092_v15  ;;  %v1098_v19 = vsel %vm1095_vm8, %v1092_v15, %v1094_v18 }
  0xbd   : > { %1664 = vmatprep.subr.msk.bf16.mxu0 %vm327_vm1, %v1097_v16  ;;  %v1109_v21 = vsel %vm327_vm1, %v1098_v19, 0 }
  0xbe   : > { %1126 = vmatpush1.bf16.msra.mxu0 %v1103_v17  ;;  %1734 = vmatpush3.bf16.msra.mxu1 %v1109_v21 }
  0xbf   : > { %v1217_v22 = vpop.permute.xlu0 %1216  ;;  %v1219_v23 = vpop.permute.xlu1 %1218  ;;  %1739 = vmatprep.subr.bf16.mxu1 %v1903_v3 }
  0xc0   : > { %v1225_v24 = vsel %vm1224_vm9, %v1217_v22, %v1219_v23 }
  0xc1   : > { %1665 = vmatmul.mubr.msk.bf16.vlgmr.msra.gmra.mxu0 %vm323_vm2, %v1663_v20  ;;  %1736 = vmatmul.mubr.msk.bf16.vlgmr.msra.gmra.mxu1 %vm323_vm2, %v1663_v20  ;;  %v1232_v27 = vsel %vm327_vm1, %v1225_v24, 0 }
  0xc2   : > { %1272 = vmatprep.mubr.bf16.mxu0 %v1904_v5  ;;  %1741 = vmatprep.mubr.msk.bf16.mxu1 %vm1905_vm0, %v1903_v3 }
  0xc3   : > { %v1221_v25 = vpop.permute.xlu0 %1220  ;;  %v1223_v28 = vpop.permute.xlu1 %1222 }
  0xc4   : > { %v1226_v26 = vsel %vm1224_vm9, %v1219_v23, %v1221_v25  ;;  %v1227_v29 = vsel %vm1224_vm9, %v1221_v25, %v1223_v28 }
  0xc5   : > { %1668 = vmatprep.subr.msk.bf16.mxu0 %vm327_vm1, %v1226_v26  ;;  %v1238_v31 = vsel %vm327_vm1, %v1227_v29, 0 }
  0xc6   : > { %1255 = vmatpush1.bf16.msra.mxu0 %v1232_v27  ;;  %1740 = vmatpush3.bf16.msra.mxu1 %v1238_v31 }
  0xc7   : > { %v1346_v32 = vpop.permute.xlu0 %1345  ;;  %v1348_v33 = vpop.permute.xlu1 %1347  ;;  %1745 = vmatprep.subr.bf16.mxu1 %v1903_v3 }
  0xc8   : > { %v1354_v34 = vsel %vm1353_vm10, %v1346_v32, %v1348_v33 }
  0xc9   : > { %1669 = vmatmul.mubr.msk.bf16.vlgmr.msra.gmra.mxu0 %vm323_vm2, %v1667_v30  ;;  %1742 = vmatmul.mubr.msk.bf16.vlgmr.msra.gmra.mxu1 %vm323_vm2, %v1667_v30  ;;  %v1361_v37 = vsel %vm327_vm1, %v1354_v34, 0 }
  0xca   : > { %1401 = vmatprep.mubr.bf16.mxu0 %v1904_v5  ;;  %1747 = vmatprep.mubr.msk.bf16.mxu1 %vm1905_vm0, %v1903_v3 }
  0xcb   : > { %v1350_v35 = vpop.permute.xlu0 %1349  ;;  %v1352_v38 = vpop.permute.xlu1 %1351 }
  0xcc   : > { %v1355_v36 = vsel %vm1353_vm10, %v1348_v33, %v1350_v35  ;;  %v1356_v39 = vsel %vm1353_vm10, %v1350_v35, %v1352_v38 }
  0xcd   : > { %1672 = vmatprep.subr.msk.bf16.mxu0 %vm327_vm1, %v1355_v36  ;;  %v1367_v5 = vsel %vm327_vm1, %v1356_v39, 0 }
  0xce   : > { %1384 = vmatpush1.bf16.msra.mxu0 %v1361_v37  ;;  %1746 = vmatpush3.bf16.msra.mxu1 %v1367_v5 }
  0xd1   : > { %1673 = vmatmul.mubr.msk.bf16.vlgmr.msra.gmra.mxu0 %vm323_vm2, %v1671_v40  ;;  %1748 = vmatmul.mubr.msk.bf16.vlgmr.msra.gmra.mxu1 %vm323_vm2, %v1671_v40 }
  0xe2   : > { %v412_v3 = vpop.f32.mrf.mxu1 }
  0xe3   : > { %v371_v41 = vpop.f32.mrf.mxu0 }
  0xe4   : > { %v1701_v43 = vpop.f32.mrf.mxu1 }
  0xe5   : > { %v373_v42 = vpop.f32.mrf.mxu0 }
  0xe6   : > { %v415_v45 = vpop.f32.mrf.mxu1 }
  0xe7   : > { %v375_v44 = vpop.f32.mrf.mxu0 }
  0xe8   : > { %v1702_v47 = vpop.f32.mrf.mxu1 }
  0xe9   : > { %v376_v46 = vpop.f32.mrf.mxu0 }
 0x159   : > { %v500_v48 = vpop.f32.mrf.mxu0  ;;  %v541_v50 = vpop.f32.mrf.mxu1 }
 0x15a   : > { %v547_v29 = vadd.f32 %v500_v48, %v371_v41  ;;  %v549_v33 = vadd.f32 %v541_v50, %v412_v3 }
 0x15b   : > { %v502_v49 = vpop.f32.mrf.mxu0  ;;  %v1707_v52 = vpop.f32.mrf.mxu1 }
 0x15c   : > { %v548_v32 = vadd.f32 %v502_v49, %v373_v42 }
 0x15d   : > { %v504_v51 = vpop.f32.mrf.mxu0  ;;  %v544_v54 = vpop.f32.mrf.mxu1 }
 0x15f   : > { %v505_v53 = vpop.f32.mrf.mxu0  ;;  %v1708_v55 = vpop.f32.mrf.mxu1 }
 0x161   : > { %v629_v56 = vpop.f32.mrf.mxu0  ;;  %v670_v58 = vpop.f32.mrf.mxu1 }
 0x162   : > { %v676_v34 = vadd.f32 %v629_v56, %v547_v29  ;;  %v678_v38 = vadd.f32 %v670_v58, %v549_v33  ;;  %v1463_v58 = vpop.permute.xlu0 %1462 }
 0x163   : > { %v631_v57 = vpop.f32.mrf.mxu0  ;;  %v1713_v60 = vpop.f32.mrf.mxu1 }
 0x164   : > { %v677_v37 = vadd.f32 %v631_v57, %v548_v32 }
 0x165   : > { %v633_v59 = vpop.f32.mrf.mxu0  ;;  %v673_v62 = vpop.f32.mrf.mxu1 }
 0x167   : > { %v634_v61 = vpop.f32.mrf.mxu0  ;;  %v1714_v63 = vpop.f32.mrf.mxu1 }
 0x169   : > { %v758_v0 = vpop.f32.mrf.mxu0  ;;  %v799_v2 = vpop.f32.mrf.mxu1 }
 0x16a   : > { %v805_v39 = vadd.f32 %v758_v0, %v676_v34  ;;  %v807_v44 = vadd.f32 %v799_v2, %v678_v38  ;;  %v1472_v0 = vpop.permute.xlu1 %1471 }
 0x16b   : > { %v760_v1 = vpop.f32.mrf.mxu0  ;;  %v1719_v6 = vpop.f32.mrf.mxu1 }
 0x16c   : > { %v806_v43 = vadd.f32 %v760_v1, %v677_v37 }
 0x16d   : > { %v762_v4 = vpop.f32.mrf.mxu0  ;;  %v802_v8 = vpop.f32.mrf.mxu1 }
 0x16f   : > { %v763_v7 = vpop.f32.mrf.mxu0  ;;  %v1720_v9 = vpop.f32.mrf.mxu1 }
 0x171   : > { %v887_v10 = vpop.f32.mrf.mxu0  ;;  %v928_v12 = vpop.f32.mrf.mxu1 }
 0x172   : > { %v934_v45 = vadd.f32 %v887_v10, %v805_v39  ;;  %v936_v48 = vadd.f32 %v928_v12, %v807_v44 }
 0x173   : > { %v889_v11 = vpop.f32.mrf.mxu0  ;;  %v1725_v14 = vpop.f32.mrf.mxu1 }
 0x174   : > { %v935_v41 = vadd.f32 %v889_v11, %v806_v43 }
 0x175   : > { %v891_v13 = vpop.f32.mrf.mxu0  ;;  %v931_v16 = vpop.f32.mrf.mxu1 }
 0x177   : > { %v892_v15 = vpop.f32.mrf.mxu0  ;;  %v1726_v17 = vpop.f32.mrf.mxu1 }
 0x179   : > { %v1016_v18 = vpop.f32.mrf.mxu0  ;;  %v1057_v20 = vpop.f32.mrf.mxu1 }
 0x17a   : > { %v1063_v51 = vadd.f32 %v1016_v18, %v934_v45  ;;  %v1065_v50 = vadd.f32 %v1057_v20, %v936_v48 }
 0x17b   : > { %v1018_v19 = vpop.f32.mrf.mxu0  ;;  %v1731_v22 = vpop.f32.mrf.mxu1 }
 0x17c   : > { %v1064_v49 = vadd.f32 %v1018_v19, %v935_v41 }
 0x17d   : > { %v1020_v21 = vpop.f32.mrf.mxu0  ;;  %v1060_v24 = vpop.f32.mrf.mxu1 }
 0x17f   : > { %v1021_v23 = vpop.f32.mrf.mxu0  ;;  %v1732_v25 = vpop.f32.mrf.mxu1 }
 0x181   : > { %v1145_v26 = vpop.f32.mrf.mxu0  ;;  %v1186_v28 = vpop.f32.mrf.mxu1 }
 0x182   : > { %v1192_v52 = vadd.f32 %v1145_v26, %v1063_v51  ;;  %v1194_v56 = vadd.f32 %v1186_v28, %v1065_v50 }
 0x183   : > { %v1147_v27 = vpop.f32.mrf.mxu0  ;;  %v1737_v31 = vpop.f32.mrf.mxu1 }
 0x184   : > { %v1193_v55 = vadd.f32 %v1147_v27, %v1064_v49 }
 0x185   : > { %v1149_v30 = vpop.f32.mrf.mxu0  ;;  %v1189_v36 = vpop.f32.mrf.mxu1 }
 0x187   : > { %v1150_v35 = vpop.f32.mrf.mxu0  ;;  %v1738_v40 = vpop.f32.mrf.mxu1 }
 0x189   : > { %v1274_v5 = vpop.f32.mrf.mxu0  ;;  %v1315_v47 = vpop.f32.mrf.mxu1 }
 0x18a   : > { %v1321_v57 = vadd.f32 %v1274_v5, %v1192_v52  ;;  %v1323_v62 = vadd.f32 %v1315_v47, %v1194_v56 }
 0x18b   : > { %v1276_v46 = vpop.f32.mrf.mxu0  ;;  %v1743_v3 = vpop.f32.mrf.mxu1 }
 0x18c   : > { %v1322_v61 = vadd.f32 %v1276_v46, %v1193_v55 }
 0x18d   : > { %v1278_v42 = vpop.f32.mrf.mxu0  ;;  %v1318_v54 = vpop.f32.mrf.mxu1 }
 0x18f   : > { %v1279_v53 = vpop.f32.mrf.mxu0  ;;  %v1744_v59 = vpop.f32.mrf.mxu1 }
 0x191   : > { %v1403_v60 = vpop.f32.mrf.mxu0  ;;  %v1444_v2 = vpop.f32.mrf.mxu1 }
 0x192   : > { %v1450_v63 = vadd.f32 %v1403_v60, %v1321_v57  ;;  %v1452_v7 = vadd.f32 %v1444_v2, %v1323_v62 }
 0x193   : > { %v1405_v1 = vpop.f32.mrf.mxu0  ;;  %v1749_v9 = vpop.f32.mrf.mxu1 }
 0x194   : > { %v1465_v4 = vmul.f32 %v1463_v58, %v1450_v63  ;;  %v1451_v6 = vadd.f32 %v1405_v1, %v1322_v61  ;;  %v1467_v11 = vmul.f32 %v1463_v58, %v1452_v7 }
 0x195   : > { %v1407_v8 = vpop.f32.mrf.mxu0  ;;  %v1447_v14 = vpop.f32.mrf.mxu1 }
 0x196   : > { %v1466_v10 = vmul.f32 %v1463_v58, %v1451_v6  ;;  %v1474_v12 = vadd.f32 %v1472_v0, %v1465_v4  ;;  %v1476_v16 = vadd.f32 %v1472_v0, %v1467_v11 }
 0x197   : > { %v1408_v13 = vpop.f32.mrf.mxu0  ;;  %v1750_v18 = vpop.f32.mrf.mxu1 }
 0x198   : > { %v1475_v15 = vadd.f32 %v1472_v0, %v1466_v10  ;;  %v1477_v17 = vmax.f32 %v1474_v12, 0.0  ;;  %v1479_v20 = vmax.f32 %v1476_v16, 0.0 }
 0x19a   : > { %v1478_v19 = vmax.f32 %v1475_v15, 0.0  ;;  %1480 = vst [vmem:[%s268_s9] sm:$0xff] %v1477_v17  ;;  %1482 = vst [vmem:[%s268_s9 + $0x10] sm:$0xff] %v1479_v20 }
 0x19c   : > { %1481 = vst [vmem:[%s268_s9 + $0x8] sm:$0xff] %v1478_v19 }
 0x19d   : > { %1837 = shalt.err (!%p1834_p5)
}
 0x19e   : > { %s1838_s26 = scalar_lea.hbm %s2123_s13, 384  ;;  %s1842_s5 = scalar_lea.hbm %s2169_s4, 768 }
 0x19f   : > { %p1839_p6 = scmp.ne.s32.totalorder %s2123_s13, %s1838_s26  ;;  %p1843_p10 = scmp.lt.s32.totalorder %s2123_s13, %s2169_s4 }
 0x1a0   : > { %p1844_p11 = scmp.lt.s32.totalorder %s1842_s5, %s1838_s26 }
 0x1a1   : > { %p1840_p7 = pnand %p1839_p6, %p1980_p4 }
 0x1a2   : > { %p1845_p12 = por %p1844_p11, %p1843_p10 }
 0x1a3   : > { %p1841_p9 = pneg %p1840_p7 }
 0x1a5   : > { %p1846_p13 = pnand %p1845_p12, %p1841_p9 }
 0x1a7   : > { %1849 = shalt.err (!%p1846_p13)
}
 0x1a8   : > { %1753 = dma.vmem_to_hbm [thread:$0]  (%p1980_p4), %s1501_s10, 384, %s2123_s13, %s1484_s18  }
 0x1a9 PF: > { %p1759_p0 = scmp.ge.s32.totalorder %s1900_s20, 2  ;;  %s1512_s8 = sand.u32 1, %s1880_s15  }
 0x1aa   : > { %s1513_s9 = scalar_lea.sflag [#allocation4], %s1512_s8 }
 0x1ab   : > { %p1756_p1 = pnand %p1759_p0, %p1987_p8 }
 0x1ad   : > { %p1757_p2 = pneg %p1756_p1 }
 0x1af   : > { %1875 = dma.done.wait (%p1757_p2), %s1513_s9, 384  }
 0x1b0   : > { %1877 = vsyncadd (%p1757_p2), %s1513_s9, 4294966912  ;;  %s17_s20 = sadd.s32 1, %s1900_s20   ;;  %s2172_s15 = smov %s1884_s16 }
 0x1b1   : > { %p14_p3 = scmp.ge.s32.totalorder %s17_s20, 4   ;;  %s2173_s16 = smov %s1888_s17 }
 0x1b2   : > { %s2174_s17 = smov %s1993_s28  ;;  %s2175_s18 = smov %s1896_s19 }
 0x1b3   : > { %s2176_s19 = smov %s2178_s23  ;;  %16 = sbr.rel (!%p14_p3) target bundleno = 4 (0x4), region = 96 }
 0x1b8   :  { %1518 = vsyncpa [#allocation4], 1 }
 0x1b9   :  { %1520 = vsyncpa [#allocation4 + $0x1], 1 }

</bundles_post_ra>
